<compile_context>
chip_gen: v7x
topology: tpu7x:2x2x1
jax: 0.10.0
libtpu: 0.0.40
codegen_flags: <defaults>
</compile_context>

<pallas_src>
import jax
import jax.numpy as jnp
from jax.experimental import pallas as pl
from jax.experimental.pallas import tpu as pltpu

n_hidden = 128
n_finger_feature = 64   # synthetic choice (module does not define it)
n_seq_feature = 96      # synthetic choice (module does not define it)


def _round_up(x, m):
    return ((x + m - 1) // m) * m


def _fused_embed_kernel(xd_ref, xp_ref, wdr_ref, wp_ref, bdr_ref, bp_ref,
                        odr_ref, op_ref):
    # xd_ref:(TB,Fd)  xp_ref:(TB,Fp)  wdr_ref:(Fd,H)  wp_ref:(Fp,H)
    # bdr_ref/bp_ref:(1,H)            odr_ref/op_ref:(TB,H)
    hd = jnp.dot(xd_ref[...], wdr_ref[...], preferred_element_type=jnp.float32)
    hp = jnp.dot(xp_ref[...], wp_ref[...], preferred_element_type=jnp.float32)
    odr_ref[...] = jnp.maximum(hd + bdr_ref[...], 0.0).astype(odr_ref.dtype)
    op_ref[...] = jnp.maximum(hp + bp_ref[...], 0.0).astype(op_ref.dtype)


def dr_p_embedding(drug_feature, protein_feature, packed_params):
    """Single fused Pallas call computing both embedding heads.

    drug_feature:    (B, n_finger_feature) f32
    protein_feature: (B, n_seq_feature)    f32
    packed_params:   (w_dr_t (Fd,H), w_p_t (Fp,H), b_dr2 (1,H), b_p2 (1,H))
    returns: (h_dr (B,H), h_p (B,H))
    """
    w_dr_t, w_p_t, b_dr2, b_p2 = packed_params
    B, Fd = drug_feature.shape
    Fp = protein_feature.shape[1]
    H = w_dr_t.shape[1]

    # Pad only to the 8-row sublane boundary (no-op when already aligned).
    # The grid uses cdiv, so large non-tile-aligned batches do NOT incur a
    # full pad-to-tile copy — Pallas masks the partial last block.
    B8 = _round_up(max(B, 8), 8)
    if B8 != B:
        drug_feature = jnp.pad(drug_feature, ((0, B8 - B), (0, 0)))
        protein_feature = jnp.pad(protein_feature, ((0, B8 - B), (0, 0)))

    TB = min(1024, B8)          # big tiles amortize per-step overhead
    grid = (pl.cdiv(B8, TB),)

    cost = pl.CostEstimate(
        flops=2 * B8 * (Fd + Fp) * H,
        transcendentals=0,
        bytes_accessed=4 * (B8 * Fd + B8 * Fp + Fd * H + Fp * H
                            + 2 * H + 2 * B8 * H),
    )

    h_dr, h_p = pl.pallas_call(
        _fused_embed_kernel,
        out_shape=(jax.ShapeDtypeStruct((B8, H), drug_feature.dtype),
                   jax.ShapeDtypeStruct((B8, H), protein_feature.dtype)),
        grid=grid,
        in_specs=[
            pl.BlockSpec((TB, Fd), lambda i: (i, 0)),   # drug activations
            pl.BlockSpec((TB, Fp), lambda i: (i, 0)),   # protein activations
            pl.BlockSpec((Fd, H), lambda i: (0, 0)),    # W_dr^T, VMEM-resident
            pl.BlockSpec((Fp, H), lambda i: (0, 0)),    # W_p^T,  VMEM-resident
            pl.BlockSpec((1, H), lambda i: (0, 0)),     # b_dr
            pl.BlockSpec((1, H), lambda i: (0, 0)),     # b_p
        ],
        out_specs=(
            pl.BlockSpec((TB, H), lambda i: (i, 0)),
            pl.BlockSpec((TB, H), lambda i: (i, 0)),
        ),
        compiler_params=pltpu.CompilerParams(
            dimension_semantics=("parallel",)),
        cost_estimate=cost,
    )(drug_feature, protein_feature, w_dr_t, w_p_t, b_dr2, b_p2)

    if B8 != B:
        h_dr = h_dr[:B]
        h_p = h_p[:B]
    return h_dr, h_p


def init_params(key):
    """Deterministic synthetic parameters matching the module's __init__ shapes.

    Returns (packed_params, raw_params):
      packed_params: pre-transposed weights / 2-D biases, ready for the kernel
                     (done ONCE here instead of per forward call).
      raw_params:    PyTorch-layout (out,in) weights for the reference check.
    """
    k1, k2, k3, k4 = jax.random.split(key, 4)
    # PyTorch nn.Linear weight shape: (out_features, in_features)
    w_dr = jax.random.normal(k1, (n_hidden, n_finger_feature), jnp.float32) * 0.05
    b_dr = jax.random.normal(k2, (n_hidden,), jnp.float32) * 0.05
    w_p = jax.random.normal(k3, (n_hidden, n_seq_feature), jnp.float32) * 0.05
    b_p = jax.random.normal(k4, (n_hidden,), jnp.float32) * 0.05

    packed = (jnp.asarray(w_dr.T),               # (Fd, H)
              jnp.asarray(w_p.T),                # (Fp, H)
              b_dr.reshape(1, n_hidden),         # (1, H)
              b_p.reshape(1, n_hidden))          # (1, H)
    raw = ((w_dr, b_dr), (w_p, b_p))
    return packed, raw


if __name__ == "__main__":
    key = jax.random.PRNGKey(0)
    kd, kp, kparam = jax.random.split(key, 3)

    batch = 8
    drug = jax.random.normal(kd, (batch, n_finger_feature), jnp.float32)
    prot = jax.random.normal(kp, (batch, n_seq_feature), jnp.float32)
    packed_params, raw_params = init_params(kparam)

    h_dr, h_p = dr_p_embedding(drug, prot, packed_params)
    jax.block_until_ready((h_dr, h_p))

    # Reference check (plain JAX, PyTorch nn.Linear semantics)
    (w_dr, b_dr), (w_p, b_p) = raw_params
    ref_dr = jnp.maximum(drug @ w_dr.T + b_dr, 0.0)
    ref_p = jnp.maximum(prot @ w_p.T + b_p, 0.0)
    assert h_dr.shape == (batch, n_hidden) and h_p.shape == (batch, n_hidden)
    assert jnp.allclose(h_dr, ref_dr, atol=1e-5)
    assert jnp.allclose(h_p, ref_p, atol=1e-5)

    print("KERNEL_OK")
</pallas_src>

<mosaic_0001>
module attributes {stable_mosaic.version = 11 : i64} {
  func.func @_fused_embed_kernel(%arg0: i32, %arg1: memref<8x64xf32, #tpu.memory_space<vmem>>, %arg2: memref<8x96xf32, #tpu.memory_space<vmem>>, %arg3: memref<64x128xf32, #tpu.memory_space<vmem>>, %arg4: memref<96x128xf32, #tpu.memory_space<vmem>>, %arg5: memref<1x128xf32, #tpu.memory_space<vmem>>, %arg6: memref<1x128xf32, #tpu.memory_space<vmem>>, %arg7: memref<8x128xf32, #tpu.memory_space<vmem>>, %arg8: memref<8x128xf32, #tpu.memory_space<vmem>>) attributes {dimension_semantics = [#tpu.dimension_semantics<parallel>], iteration_bounds = array<i64: 1>, scalar_prefetch = 0 : i64, scratch_operands = 0 : i64, tpu.core_type = #tpu.core_type<tc>, window_params = [{transform_indices = @transform_0, window_bounds = array<i64: 8, 64>}, {transform_indices = @transform_1, window_bounds = array<i64: 8, 96>}, {pipeline_mode = #tpu.pipeline_mode<synchronous>, transform_indices = @transform_2, window_bounds = array<i64: 64, 128>}, {pipeline_mode = #tpu.pipeline_mode<synchronous>, transform_indices = @transform_3, window_bounds = array<i64: 96, 128>}, {pipeline_mode = #tpu.pipeline_mode<synchronous>, transform_indices = @transform_4, window_bounds = array<i64: 1, 128>}, {pipeline_mode = #tpu.pipeline_mode<synchronous>, transform_indices = @transform_5, window_bounds = array<i64: 1, 128>}, {transform_indices = @transform_6, window_bounds = array<i64: 8, 128>}, {transform_indices = @transform_7, window_bounds = array<i64: 8, 128>}]} {
    %c0 = arith.constant 0 : index
    %c0_0 = arith.constant 0 : index
    %0 = vector.load %arg1[%c0, %c0_0] : memref<8x64xf32, #tpu.memory_space<vmem>>, vector<8x64xf32>
    %c0_1 = arith.constant 0 : index
    %c0_2 = arith.constant 0 : index
    %1 = vector.load %arg3[%c0_1, %c0_2] : memref<64x128xf32, #tpu.memory_space<vmem>>, vector<64x128xf32>
    %cst = arith.constant dense<0.000000e+00> : vector<8x128xf32>
    %2 = tpu.matmul %0, %1, %cst {dimension_numbers = #tpu.dot_dimension_numbers<[1], [0], [0], [1], [0, 0, 1, 1], [], []>} : vector<8x64xf32>, vector<64x128xf32>, vector<8x128xf32> -> vector<8x128xf32>
    %c0_3 = arith.constant 0 : index
    %c0_4 = arith.constant 0 : index
    %3 = vector.load %arg2[%c0_3, %c0_4] : memref<8x96xf32, #tpu.memory_space<vmem>>, vector<8x96xf32>
    %c0_5 = arith.constant 0 : index
    %c0_6 = arith.constant 0 : index
    %4 = vector.load %arg4[%c0_5, %c0_6] : memref<96x128xf32, #tpu.memory_space<vmem>>, vector<96x128xf32>
    %cst_7 = arith.constant dense<0.000000e+00> : vector<8x128xf32>
    %5 = tpu.matmul %3, %4, %cst_7 {dimension_numbers = #tpu.dot_dimension_numbers<[1], [0], [0], [1], [0, 0, 1, 1], [], []>} : vector<8x96xf32>, vector<96x128xf32>, vector<8x128xf32> -> vector<8x128xf32>
    %c0_8 = arith.constant 0 : index
    %c0_9 = arith.constant 0 : index
    %6 = vector.load %arg5[%c0_8, %c0_9] : memref<1x128xf32, #tpu.memory_space<vmem>>, vector<1x128xf32>
    %7 = vector.broadcast %6 : vector<1x128xf32> to vector<8x128xf32>
    %8 = arith.addf %2, %7 : vector<8x128xf32>
    %cst_10 = arith.constant 0.000000e+00 : f32
    %9 = vector.broadcast %cst_10 : f32 to vector<8x128xf32>
    %10 = arith.maximumf %8, %9 : vector<8x128xf32>
    %c0_11 = arith.constant 0 : index
    %c0_12 = arith.constant 0 : index
    %11 = vector.load %arg7[%c0_11, %c0_12] : memref<8x128xf32, #tpu.memory_space<vmem>>, vector<8x128xf32>
    tpu.vector_store %arg7[%c0_11, %c0_12], %10 {strides = array<i32>} : memref<8x128xf32, #tpu.memory_space<vmem>>, vector<8x128xf32>,
    %c0_13 = arith.constant 0 : index
    %c0_14 = arith.constant 0 : index
    %12 = vector.load %arg6[%c0_13, %c0_14] : memref<1x128xf32, #tpu.memory_space<vmem>>, vector<1x128xf32>
    %13 = vector.broadcast %12 : vector<1x128xf32> to vector<8x128xf32>
    %14 = arith.addf %5, %13 : vector<8x128xf32>
    %cst_15 = arith.constant 0.000000e+00 : f32
    %15 = vector.broadcast %cst_15 : f32 to vector<8x128xf32>
    %16 = arith.maximumf %14, %15 : vector<8x128xf32>
    %c0_16 = arith.constant 0 : index
    %c0_17 = arith.constant 0 : index
    %17 = vector.load %arg8[%c0_16, %c0_17] : memref<8x128xf32, #tpu.memory_space<vmem>>, vector<8x128xf32>
    tpu.vector_store %arg8[%c0_16, %c0_17], %16 {strides = array<i32>} : memref<8x128xf32, #tpu.memory_space<vmem>>, vector<8x128xf32>,
    return
  }
  func.func @transform_0(%arg0: i32) -> (i32, i32) {
    %c0_i32 = arith.constant 0 : i32
    %c0_i32_0 = arith.constant 0 : i32
    return %arg0, %c0_i32 : i32, i32
  }
  func.func @transform_1(%arg0: i32) -> (i32, i32) {
    %c0_i32 = arith.constant 0 : i32
    %c0_i32_0 = arith.constant 0 : i32
    return %arg0, %c0_i32 : i32, i32
  }
  func.func @transform_2(%arg0: i32) -> (i32, i32) {
    %c0_i32 = arith.constant 0 : i32
    %c0_i32_0 = arith.constant 0 : i32
    %c0_i32_1 = arith.constant 0 : i32
    return %c0_i32, %c0_i32_0 : i32, i32
  }
  func.func @transform_3(%arg0: i32) -> (i32, i32) {
    %c0_i32 = arith.constant 0 : i32
    %c0_i32_0 = arith.constant 0 : i32
    %c0_i32_1 = arith.constant 0 : i32
    return %c0_i32, %c0_i32_0 : i32, i32
  }
  func.func @transform_4(%arg0: i32) -> (i32, i32) {
    %c0_i32 = arith.constant 0 : i32
    %c0_i32_0 = arith.constant 0 : i32
    %c0_i32_1 = arith.constant 0 : i32
    return %c0_i32, %c0_i32_0 : i32, i32
  }
  func.func @transform_5(%arg0: i32) -> (i32, i32) {
    %c0_i32 = arith.constant 0 : i32
    %c0_i32_0 = arith.constant 0 : i32
    %c0_i32_1 = arith.constant 0 : i32
    return %c0_i32, %c0_i32_0 : i32, i32
  }
  func.func @transform_6(%arg0: i32) -> (i32, i32) {
    %c0_i32 = arith.constant 0 : i32
    %c0_i32_0 = arith.constant 0 : i32
    return %arg0, %c0_i32 : i32, i32
  }
  func.func @transform_7(%arg0: i32) -> (i32, i32) {
    %c0_i32 = arith.constant 0 : i32
    %c0_i32_0 = arith.constant 0 : i32
    return %arg0, %c0_i32 : i32, i32
  }
}

</mosaic_0001>

<bundles_post_ra>
// kernel: tpu_custom_call.1
= control target key start
LH: loop header
LB: loop body
LE: loop exit
PB: predicated region body
PF: predicated region fallthrough
CT: control target
= control target key end

     0   :  { %13 = vsyncpa [#allocation3], 0  ;;  %s681_s0 = inlined_call_operand.hbm [shape: f32[8,64], index: 0, kind: input, shape index: {}]   ;;  %s682_s1 = inlined_call_operand.hbm [shape: f32[8,96], index: 1, kind: input, shape index: {}]   ;;  %s683_s2 = inlined_call_operand.hbm [shape: f32[64,128], index: 2, kind: input, shape index: {}]   ;;  %s684_s3 = inlined_call_operand.hbm [shape: f32[96,128], index: 3, kind: input, shape index: {}]   ;;  %s685_s4 = inlined_call_operand.vmem [shape: f32[1,128], index: 4, kind: input, shape index: {}]   ;;  %s686_s5 = inlined_call_operand.vmem [shape: f32[1,128], index: 5, kind: input, shape index: {}]   ;;  %s687_s6 = inlined_call_operand.hbm [shape: f32[8,128], index: 6, kind: output, shape index: {0}]   ;;  %s688_s7 = inlined_call_operand.hbm [shape: f32[8,128], index: 7, kind: output, shape index: {1}]  }
   0x1   :  { %14 = vsyncpa [#allocation6], 0 }
   0x2   :  { %15 = vsyncpa [#allocation9], 0 }
   0x3   :  { %16 = vsyncpa [#allocation4], 0 }
   0x4   :  { %17 = vsyncpa [#allocation12], 0  ;;  %s552_s24 = smov [#allocation5]   ;;  %s553_s26 = smov [#allocation2]  }
   0x5   :  { %s34_s25 = sshll.u32 %s552_s24, 4  ;;  %s24_s27 = sshll.u32 %s553_s26, 4  ;;  %s35_s25 = int_to_ptr.vmem [resolvable:$true] %s34_s25  ;;  %s25_s27 = int_to_ptr.vmem [resolvable:$true] %s24_s27 }
   0x6   :  { %s410_s30 = scalar_lea.hbm %s682_s1, 128 }
   0x7   :  { %p411_p0 = scmp.ne.s32.totalorder %s682_s1, %s410_s30  ;;  %p414_p1 = scmp.lt.u32.totalorder %s410_s30, %s682_s1 }
   0x9   :  { %p416_p2 = pnand %p414_p1, %p411_p0 }
   0xb   :  { %419 = shalt.err (!%p416_p2)
}
   0xc   :  { %s420_s12 = scalar_lea.vmem %s35_s25, 128  ;;  %p425_p4 = scmp.lt.s32.totalorder %s35_s25, %s35_s25 }
   0xd   :  { %p421_p3 = scmp.ne.s32.totalorder %s35_s25, %s420_s12  ;;  %p426_p5 = scmp.lt.s32.totalorder %s420_s12, %s420_s12 }
   0xf   :  { %p427_p6 = por %p426_p5, %p425_p4 }
  0x11   :  { %p428_p7 = pnand %p427_p6, %p421_p3 }
  0x13   :  { %431 = shalt.err (!%p428_p7)
}
  0x14   :  { %37 = dma.hbm_to_vmem [thread:$0]  %s682_s1, 128, %s35_s25, [#allocation6]  }
  0x15   :  { %s432_s17 = scalar_lea.hbm %s681_s0, 128 }
  0x16   :  { %p433_p8 = scmp.ne.s32.totalorder %s681_s0, %s432_s17  ;;  %p436_p9 = scmp.lt.u32.totalorder %s432_s17, %s681_s0 }
  0x18   :  { %p438_p10 = pnand %p436_p9, %p433_p8 }
  0x1a   :  { %441 = shalt.err (!%p438_p10)
}
  0x1b   :  { %s442_s22 = scalar_lea.vmem %s25_s27, 128  ;;  %p447_p12 = scmp.lt.s32.totalorder %s25_s27, %s25_s27 }
  0x1c   :  { %p443_p11 = scmp.ne.s32.totalorder %s25_s27, %s442_s22  ;;  %p448_p13 = scmp.lt.s32.totalorder %s442_s22, %s442_s22 }
  0x1e   :  { %p449_p0 = por %p448_p13, %p447_p12 }
  0x20   :  { %p450_p1 = pnand %p449_p0, %p443_p11 }
  0x22   :  { %453 = shalt.err (!%p450_p1)
}
  0x23   :  { %27 = dma.hbm_to_vmem [thread:$0]  %s681_s0, 128, %s25_s27, [#allocation3]  }
  0x24   :  { %s554_s24 = smov [#allocation7]   ;;  %s454_s29 = scalar_lea.hbm %s683_s2, 1024 }
  0x25   :  { %s43_s25 = sshll.u32 %s554_s24, 4  ;;  %p455_p2 = scmp.ne.s32.totalorder %s683_s2, %s454_s29  ;;  %s44_s25 = int_to_ptr.vmem [resolvable:$true] %s43_s25 }
  0x26   :  { %p458_p3 = scmp.lt.u32.totalorder %s454_s29, %s683_s2 }
  0x28   :  { %p460_p4 = pnand %p458_p3, %p455_p2 }
  0x2a   :  { %463 = shalt.err (!%p460_p4)
}
  0x2b   :  { %s464_s11 = scalar_lea.vmem %s44_s25, 1024  ;;  %p469_p6 = scmp.lt.s32.totalorder %s44_s25, %s44_s25 }
  0x2c   :  { %p465_p5 = scmp.ne.s32.totalorder %s44_s25, %s464_s11  ;;  %p470_p7 = scmp.lt.s32.totalorder %s464_s11, %s464_s11 }
  0x2e   :  { %p471_p8 = por %p470_p7, %p469_p6 }
  0x30   :  { %p472_p9 = pnand %p471_p8, %p465_p5 }
  0x32   :  { %475 = shalt.err (!%p472_p9)
}
  0x33   :  { %s555_s0 = smov 128   ;;  %s556_s27 = smov 8  }
  0x34   :  { %49 = dma.hbm_to_vmem [thread:$0]  %s683_s2, 1024, %s44_s25, [#allocation6], %s555_s0, %s555_s0, %s556_s27  }
  0x35   :  { %s557_s14 = smov [#allocation8]   ;;  %s476_s18 = scalar_lea.hbm %s684_s3, 1536 }
  0x36   :  { %s55_s15 = sshll.u32 %s557_s14, 4  ;;  %p477_p10 = scmp.ne.s32.totalorder %s684_s3, %s476_s18  ;;  %s56_s15 = int_to_ptr.vmem [resolvable:$true] %s55_s15 }
  0x37   :  { %p480_p11 = scmp.lt.u32.totalorder %s476_s18, %s684_s3 }
  0x39   :  { %p482_p12 = pnand %p480_p11, %p477_p10 }
  0x3b   :  { %485 = shalt.err (!%p482_p12)
}
  0x3c   :  { %s486_s1 = scalar_lea.vmem %s56_s15, 1536  ;;  %p491_p0 = scmp.lt.s32.totalorder %s56_s15, %s56_s15 }
  0x3d   :  { %p487_p13 = scmp.ne.s32.totalorder %s56_s15, %s486_s1  ;;  %p492_p1 = scmp.lt.s32.totalorder %s486_s1, %s486_s1 }
  0x3f   :  { %p493_p2 = por %p492_p1, %p491_p0 }
  0x41   :  { %p494_p3 = pnand %p493_p2, %p487_p13 }
  0x43   :  { %497 = shalt.err (!%p494_p3)
}
  0x44   :  { %61 = dma.hbm_to_vmem [thread:$0]  %s684_s3, 1536, %s56_s15, [#allocation9], %s555_s0, %s555_s0, %s556_s27  }
  0x45   :  { %542 = dma.done.wait [#allocation3], 128  }
  0x46   :  { %543 = vsyncadd [#allocation3], 4294967168 }
  0x47   :  { %544 = dma.done.wait [#allocation6], 1152  }
  0x48   :  { %545 = vsyncadd [#allocation6], 4294966144 }
  0x49   :  { %546 = dma.done.wait [#allocation9], 1536  }
  0x4a   :  { %547 = vsyncadd [#allocation9], 4294965760  ;;  %v558_v0 = vmov 0.0|0.0   ;;  %vm559_vm0 = vmmov 0   ;;  %v560_v1 = vmov 0.0   ;;  %v88_v2 = vld [vmem:[#allocation8] sm:$0xff] }
  0x4b   :  { %381 = vmatprep.subr.bf16.mxu1 %v558_v0  ;;  %369 = vmatprep.subr.bf16.mxu0 %v558_v0  ;;  %v89_v3 = vld [vmem:[#allocation8 + $0x8] sm:$0xff]  ;;  %v90_v4 = vld [vmem:[#allocation8 + $0x10] sm:$0xff]  ;;  %v91_v6 = vld [vmem:[#allocation8 + $0x18] sm:$0xff]  ;;  %vm107_vm1 = vcmask 523264   ;;  %vm190_vm2 = vcmask 785408   ;;  %s561_s25 = smov [#allocation10]  }
  0x4c   :  { %339 = vmatprep.mubr.msk.f32.mxu0 %vm559_vm0, %v560_v1  ;;  %366 = vmatprep.mubr.msk.f32.mxu1 %vm559_vm0, %v560_v1  ;;  %v382_v5 = vpack.c.bf16 %v89_v3, %v88_v2  ;;  %v79_v7 = vld [vmem:[#allocation7] sm:$0xff]  ;;  %v80_v8 = vld [vmem:[#allocation7 + $0x8] sm:$0xff]  ;;  %v81_v10 = vld [vmem:[#allocation7 + $0x10] sm:$0xff]  ;;  %v385_v11 = vpack.c.bf16 %v91_v6, %v90_v4  ;;  %s272_s26 = sshll.u32 %s561_s25, 4  ;;  %s273_s26 = int_to_ptr.vmem [resolvable:$true] %s272_s26 }
  0x4d   :  { %v370_v9 = vpack.c.bf16 %v80_v8, %v79_v7  ;;  %v82_v12 = vld [vmem:[#allocation7 + $0x18] sm:$0xff]  ;;  %v92_v13 = vld [vmem:[#allocation8 + $0x20] sm:$0xff]  ;;  %v93_v14 = vld [vmem:[#allocation8 + $0x28] sm:$0xff]  ;;  %s498_s30 = scalar_lea.vmem %s273_s26, 128  ;;  %p503_p5 = scmp.lt.s32.totalorder %s273_s26, %s273_s26 }
  0x4e   :  { %383 = vmatpush3.bf16.msra.mxu1 %v382_v5  ;;  %v373_v15 = vpack.c.bf16 %v82_v12, %v81_v10  ;;  %v83_v16 = vld [vmem:[#allocation7 + $0x20] sm:$0xff]  ;;  %v84_v17 = vld [vmem:[#allocation7 + $0x28] sm:$0xff]  ;;  %v388_v18 = vpack.c.bf16 %v93_v14, %v92_v13  ;;  %v94_v19 = vld [vmem:[#allocation8 + $0x30] sm:$0xff]  ;;  %p499_p4 = scmp.ne.s32.totalorder %s273_s26, %s498_s30  ;;  %p504_p6 = scmp.lt.s32.totalorder %s498_s30, %s498_s30 }
  0x4f   :  { %384 = vmatprep.subr.bf16.mxu1 %v558_v0  ;;  %371 = vmatpush3.bf16.msra.mxu0 %v370_v9  ;;  %v95_v20 = vld [vmem:[#allocation8 + $0x38] sm:$0xff]  ;;  %v376_v21 = vpack.c.bf16 %v84_v17, %v83_v16  ;;  %v85_v22 = vld [vmem:[#allocation7 + $0x30] sm:$0xff]  ;;  %v96_v25 = vld [vmem:[#allocation8 + $0x40] sm:$0xff] }
  0x50   :  { %372 = vmatprep.subr.bf16.mxu0 %v558_v0  ;;  %v86_v23 = vld [vmem:[#allocation7 + $0x38] sm:$0xff]  ;;  %v391_v24 = vpack.c.bf16 %v95_v20, %v94_v19  ;;  %v97_v26 = vld [vmem:[#allocation8 + $0x48] sm:$0xff]  ;;  %v98_v29 = vld [vmem:[#allocation8 + $0x50] sm:$0xff]  ;;  %p505_p7 = por %p504_p6, %p503_p5 }
  0x51   :  { %v379_v27 = vpack.c.bf16 %v86_v23, %v85_v22  ;;  %v394_v28 = vpack.c.bf16 %v97_v26, %v96_v25  ;;  %v99_v30 = vld [vmem:[#allocation8 + $0x58] sm:$0xff]  ;;  %v78_v31 = vld [vmem:[#allocation2] sm:$0xff] }
  0x52   :  { %386 = vmatpush3.bf16.msra.mxu1 %v385_v11  ;;  %v397_v32 = vpack.c.bf16 %v99_v30, %v98_v29  ;;  %v87_v33 = vld [vmem:[#allocation5] sm:$0xff]  ;;  %v297_v34 = vld [vmem:[%s685_s4] ss:$0 sm:$0xff]  ;;  %p506_p8 = pnand %p505_p7, %p499_p4 }
  0x53   :  { %387 = vmatprep.subr.bf16.mxu1 %v558_v0  ;;  %374 = vmatpush3.bf16.msra.mxu0 %v373_v15  ;;  %v299_v39 = vld [vmem:[%s686_s5] ss:$0 sm:$0xff] }
  0x54   :  { %375 = vmatprep.subr.bf16.mxu0 %v558_v0 }
  0x56   :  { %389 = vmatpush3.bf16.msra.mxu1 %v388_v18 }
  0x57   :  { %390 = vmatprep.subr.bf16.mxu1 %v558_v0  ;;  %377 = vmatpush3.bf16.msra.mxu0 %v376_v21 }
  0x58   :  { %378 = vmatprep.subr.bf16.mxu0 %v558_v0 }
  0x5a   :  { %392 = vmatpush3.bf16.msra.mxu1 %v391_v24 }
  0x5b   :  { %393 = vmatprep.subr.bf16.mxu1 %v558_v0  ;;  %380 = vmatpush3.bf16.msra.mxu0 %v379_v27 }
  0x5e   :  { %395 = vmatpush3.bf16.msra.mxu1 %v394_v28  ;;  %340 = vmatmul.mubr.msk.f32.vlgmr.msra.gmra.mrb[0].mxu0 %vm107_vm1, %v78_v31 }
  0x5f   :  { %396 = vmatprep.subr.bf16.mxu1 %v558_v0 }
  0x62   :  { %398 = vmatpush3.bf16.msra.mxu1 %v397_v32 }
  0x65   :  { %367 = vmatmul.mubr.msk.f32.vlgmr.msra.gmra.mrb[0].mxu1 %vm190_vm2, %v87_v33 }
 0x131   :  { %v177_v35 = vpop.f32.mrb[0].mxu0 }
 0x132   :  { %v178_v36 = vadd.f32 %v297_v34, %v177_v35  ;;  %v341_v37 = vpop.f32.mrb[1].mxu0 }
 0x134   :  { %v181_v38 = vmax.f32 %v178_v36, 0.0 }
 0x136   :  { %182 = vst [vmem:[#allocation10] sm:$0xff] %v181_v38 }
 0x137   :  { %509 = shalt.err (!%p506_p8)
}
 0x138   :  { %s510_s9 = scalar_lea.hbm %s687_s6, 128 }
 0x139   :  { %p511_p9 = scmp.ne.s32.totalorder %s687_s6, %s510_s9  ;;  %p514_p10 = scmp.lt.u32.totalorder %s510_s9, %s687_s6 }
 0x13b   :  { %p516_p11 = pnand %p514_p10, %p511_p9 }
 0x13d   :  { %519 = shalt.err (!%p516_p11)
}
 0x13e   :  { %275 = dma.vmem_to_hbm [thread:$0]  %s273_s26, 128, %s687_s6, [#allocation4]   ;;  %v260_v40 = vpop.f32.mrb[0].mxu1 }
 0x13f   :  { %s562_s13 = smov [#allocation11]   ;;  %v261_v41 = vadd.f32 %v299_v39, %v260_v40  ;;  %v368_v42 = vpop.f32.mrb[1].mxu1 }
 0x140   :  { %s282_s14 = sshll.u32 %s562_s13, 4  ;;  %s283_s14 = int_to_ptr.vmem [resolvable:$true] %s282_s14 }
 0x141   :  { %v264_v43 = vmax.f32 %v261_v41, 0.0  ;;  %s520_s15 = scalar_lea.vmem %s283_s14, 128  ;;  %p525_p13 = scmp.lt.s32.totalorder %s283_s14, %s283_s14 }
 0x142   :  { %p521_p12 = scmp.ne.s32.totalorder %s283_s14, %s520_s15  ;;  %p526_p0 = scmp.lt.s32.totalorder %s520_s15, %s520_s15 }
 0x143   :  { %265 = vst [vmem:[#allocation11] sm:$0xff] %v264_v43 }
 0x144   :  { %p527_p1 = por %p526_p0, %p525_p13 }
 0x146   :  { %p528_p2 = pnand %p527_p1, %p521_p12 }
 0x148   :  { %531 = shalt.err (!%p528_p2)
}
 0x149   :  { %s532_s18 = scalar_lea.hbm %s688_s7, 128 }
 0x14a   :  { %p533_p3 = scmp.ne.s32.totalorder %s688_s7, %s532_s18  ;;  %p536_p4 = scmp.lt.u32.totalorder %s532_s18, %s688_s7 }
 0x14c   :  { %p538_p5 = pnand %p536_p4, %p533_p3 }
 0x14e   :  { %541 = shalt.err (!%p538_p5)
}
 0x14f   :  { %285 = dma.vmem_to_hbm [thread:$0]  %s283_s14, 128, %s688_s7, [#allocation12]  }
 0x150   :  { %548 = dma.done.wait [#allocation4], 128  }
 0x151   :  { %549 = vsyncadd [#allocation4], 4294967168 }
 0x152   :  { %550 = dma.done.wait [#allocation12], 128  }
 0x153   :  { %551 = vsyncadd [#allocation12], 4294967168 }
 0x154   :  { %292 = vsyncpa [#allocation3], 1 }
 0x155   :  { %293 = vsyncpa [#allocation6], 1 }
 0x156   :  { %294 = vsyncpa [#allocation9], 1 }
 0x157   :  { %295 = vsyncpa [#allocation4], 1 }
 0x158   :  { %296 = vsyncpa [#allocation12], 1 }

</bundles_post_ra>
